<compile_context>
chip_gen: v7x
topology: tpu7x:2x2x1
jax: 0.10.0
libtpu: 0.0.40
codegen_flags: <defaults>
</compile_context>

<pallas_src>
import jax
import jax.numpy as jnp
from jax.experimental import pallas as pl
from jax.experimental.pallas import tpu as pltpu


def _q_estimator_kernel(state_ref, action_ref,
                        w1_ref, b1_ref,
                        w2x_ref, w2a_ref, b2_ref,
                        w3c_ref, b3_ref,
                        out_ref):
    # fc1 + relu  (MXU matmul, f32 accumulate; element-wise stays f32).
    h1 = jnp.dot(state_ref[...], w1_ref[...],
                 preferred_element_type=jnp.float32)
    h1 = jnp.maximum(h1 + b1_ref[...], 0.0)

    # fc2 over the folded cat([h1, action]):
    #   cat(h1, a) @ W2 == h1 @ W2x + a @ W2a  -- both terms on the MXU
    # (the tiny K=action_dim term used to be VPU broadcast-FMAs; the VALU was
    #  the saturating slot, the MXU has headroom).
    h2 = jnp.dot(h1.astype(w2x_ref.dtype), w2x_ref[...],
                 preferred_element_type=jnp.float32)
    h2 = h2 + jnp.dot(action_ref[...], w2a_ref[...],
                      preferred_element_type=jnp.float32)
    h2 = jnp.maximum(h2 + b2_ref[...], 0.0)

    # fc3 (out=1) on the MXU (N=1 column, f32), then stored lane-dense as a
    # (1, TB) row of the output slab (sublane->lane relayout stays off the VALU).
    q = jnp.dot(h2, w3c_ref[...], preferred_element_type=jnp.float32)  # (TB, 1)
    out_ref[...] = (q[:, 0][None, :] + b3_ref[...]).astype(out_ref.dtype)


def _round_up(x, m):
    return ((x + m - 1) // m) * m


def _auto_tile_b(B, *, cap=2048, align=16):
    """Pick the batch tile.

    Big enough to amortize per-grid-step overhead (~0.35us), capped, kept a
    multiple of 16 (bf16 sublane packing), and chosen so there are >=2 tiles
    when possible so the 'parallel' grid axis feeds both v7x TensorCores.
    """
    if B <= align:
        return B                       # single full block (equal-full-dim rule)
    return max(align, min(cap, _round_up(pl.cdiv(B, 2), align)))


def q_estimator_forward(state, action, params, *, tile_b=None,
                        use_bf16_matmul=True):
    """state: [B, state_dim], action: [B, action_dim] -> [B, 1] (f32)."""
    w1, b1, w2x, w2a, b2, w3, b3 = params
    B, _ = state.shape
    fc2 = w2x.shape[1]
    out_dim = w3.shape[1]
    # TODO(synk): generalize the lane-dense fc3/output path for out_dim > 1
    # (the module default -- and the Q(s,a) use case -- is out=1).
    assert out_dim == 1, "kernel implements the module default out=1"

    # fc3 weight as a (fc2, 1) column (kept f32); biases as f32 rows.
    w3c = w3.reshape(fc2, 1).astype(jnp.float32)
    b1 = b1.reshape(1, -1).astype(jnp.float32)
    b2 = b2.reshape(1, -1).astype(jnp.float32)
    b3 = b3.reshape(1, 1).astype(jnp.float32)

    if use_bf16_matmul:
        # bf16 only on the MXU operands (halves streamed state/action DMA and
        # weight traffic; v5e's MXU is bf16-native). Biases, element-wise math
        # and all accumulation stay f32.
        # NOTE: ideally the caller already hands over bf16 state/action so the
        # astype below is a no-op instead of an extra HBM pass.
        mxu_dt = jnp.bfloat16
        if state.dtype != mxu_dt:
            state = state.astype(mxu_dt)
        if action.dtype != mxu_dt:
            action = action.astype(mxu_dt)
        w1 = w1.astype(mxu_dt)
        w2x = w2x.astype(mxu_dt)
        w2a = w2a.astype(mxu_dt)

    if tile_b is None:
        tile_b = _auto_tile_b(B)
    if use_bf16_matmul:
        assert tile_b % 16 == 0 or tile_b == B, \
            "tile_b must be a multiple of 16 when use_bf16_matmul=True"

    num_tiles = pl.cdiv(B, tile_b)
    # No jnp.pad pre-pass: ragged last tiles are partial edge blocks; garbage
    # rows only produce garbage in their own (sliced-off) output slab columns.

    # Streamed (batch-tiled, double-buffered) operands vs VMEM-resident weights.
    batch_spec = lambda a: pl.BlockSpec((tile_b, a.shape[1]), lambda i: (i, 0))
    resident = lambda a: pl.BlockSpec(a.shape, lambda i: (0, 0))

    out = pl.pallas_call(
        _q_estimator_kernel,
        out_shape=jax.ShapeDtypeStruct((num_tiles, tile_b), jnp.float32),
        grid=(num_tiles,),
        in_specs=[batch_spec(state), batch_spec(action),
                  resident(w1), resident(b1),
                  resident(w2x), resident(w2a), resident(b2),
                  resident(w3c), resident(b3)],
        out_specs=pl.BlockSpec((1, tile_b), lambda i: (i, 0)),
        compiler_params=pltpu.CompilerParams(
            dimension_semantics=("parallel",)),
    )(state, action, w1, b1, w2x, w2a, b2, w3c, b3)

    # lane-dense slab -> [B, 1]
    return out.reshape(num_tiles * tile_b, 1)[:B]


def init_params(key, state_dim, action_dim, out=1, fc1=64, fc2=128):
    """Deterministic synthetic init (uniform, PyTorch-Linear-like scaling).

    Weights are stored as [in_features, out_features]; fc2's weight is split
    into the rows acting on the fc1 output and on the action (folded cat).
    """
    ks = jax.random.split(key, 6)

    def lin(kw, kb, fan_in, fan_out):
        bound = 1.0 / jnp.sqrt(jnp.float32(fan_in))
        w = jax.random.uniform(kw, (fan_in, fan_out), jnp.float32, -bound, bound)
        b = jax.random.uniform(kb, (1, fan_out), jnp.float32, -bound, bound)
        return w, b

    w1, b1 = lin(ks[0], ks[1], state_dim, fc1)
    w2, b2 = lin(ks[2], ks[3], fc1 + action_dim, fc2)
    w3, b3 = lin(ks[4], ks[5], fc2, out)
    w2x, w2a = w2[:fc1, :], w2[fc1:, :]   # split = the torch.cat, folded away
    return (w1, b1, w2x, w2a, b2, w3, b3)


def reference_forward(state, action, params):
    """Pure-JAX reference mirroring the PyTorch forward exactly."""
    w1, b1, w2x, w2a, b2, w3, b3 = params
    x = jnp.maximum(state @ w1 + b1, 0.0)
    x = jnp.concatenate([x, action], axis=1)
    w2 = jnp.concatenate([w2x, w2a], axis=0)
    x = jnp.maximum(x @ w2 + b2, 0.0)
    return x @ w3 + b3


if __name__ == "__main__":
    key = jax.random.PRNGKey(0)
    k_data, k_p = jax.random.split(key, 2)

    state_dim, action_dim = 16, 4
    params = init_params(k_p, state_dim, action_dim, out=1, fc1=64, fc2=128)

    # 8: single tiny tile; 200: 2 tiles + ragged edge; 3000: large auto tile,
    # 2 tiles (megacore path) + ragged edge.
    for B in (8, 200, 3000):
        ks, ka = jax.random.split(jax.random.fold_in(k_data, B), 2)
        state = jax.random.normal(ks, (B, state_dim), jnp.float32)
        action = jax.random.normal(ka, (B, action_dim), jnp.float32)

        q_ref = reference_forward(state, action, params)

        # f32 MXU path (tight tolerance)
        q32 = q_estimator_forward(state, action, params, use_bf16_matmul=False)
        jax.block_until_ready(q32)
        assert q32.shape == (B, 1)
        assert jnp.allclose(q32, q_ref, atol=1e-4, rtol=1e-4), \
            f"f32 mismatch at B={B}: {jnp.max(jnp.abs(q32 - q_ref))}"

        # default bf16-MXU path (looser tolerance)
        q_bf = q_estimator_forward(state, action, params)
        jax.block_until_ready(q_bf)
        assert q_bf.shape == (B, 1)
        assert jnp.allclose(q_bf, q_ref, atol=5e-2, rtol=5e-2), \
            f"bf16 mismatch at B={B}: {jnp.max(jnp.abs(q_bf - q_ref))}"

    print("KERNEL_OK")
</pallas_src>

<mosaic_0001>
module attributes {stable_mosaic.version = 11 : i64} {
  func.func @_q_estimator_kernel(%arg0: i32, %arg1: memref<8x16xf32, #tpu.memory_space<vmem>>, %arg2: memref<8x4xf32, #tpu.memory_space<vmem>>, %arg3: memref<16x64xf32, #tpu.memory_space<vmem>>, %arg4: memref<1x64xf32, #tpu.memory_space<vmem>>, %arg5: memref<64x128xf32, #tpu.memory_space<vmem>>, %arg6: memref<4x128xf32, #tpu.memory_space<vmem>>, %arg7: memref<1x128xf32, #tpu.memory_space<vmem>>, %arg8: memref<128x1xf32, #tpu.memory_space<vmem>>, %arg9: memref<1x1xf32, #tpu.memory_space<vmem>>, %arg10: memref<1x8xf32, #tpu.memory_space<vmem>>) attributes {dimension_semantics = [#tpu.dimension_semantics<parallel>], iteration_bounds = array<i64: 1>, scalar_prefetch = 0 : i64, scratch_operands = 0 : i64, tpu.core_type = #tpu.core_type<tc>, window_params = [{transform_indices = @transform_0, window_bounds = array<i64: 8, 16>}, {transform_indices = @transform_1, window_bounds = array<i64: 8, 4>}, {pipeline_mode = #tpu.pipeline_mode<synchronous>, transform_indices = @transform_2, window_bounds = array<i64: 16, 64>}, {pipeline_mode = #tpu.pipeline_mode<synchronous>, transform_indices = @transform_3, window_bounds = array<i64: 1, 64>}, {pipeline_mode = #tpu.pipeline_mode<synchronous>, transform_indices = @transform_4, window_bounds = array<i64: 64, 128>}, {pipeline_mode = #tpu.pipeline_mode<synchronous>, transform_indices = @transform_5, window_bounds = array<i64: 4, 128>}, {pipeline_mode = #tpu.pipeline_mode<synchronous>, transform_indices = @transform_6, window_bounds = array<i64: 1, 128>}, {pipeline_mode = #tpu.pipeline_mode<synchronous>, transform_indices = @transform_7, window_bounds = array<i64: 128, 1>}, {pipeline_mode = #tpu.pipeline_mode<synchronous>, transform_indices = @transform_8, window_bounds = array<i64: 1, 1>}, {transform_indices = @transform_9, window_bounds = array<i64: 1, 8>}]} {
    %c0 = arith.constant 0 : index
    %c0_0 = arith.constant 0 : index
    %0 = vector.load %arg1[%c0, %c0_0] : memref<8x16xf32, #tpu.memory_space<vmem>>, vector<8x16xf32>
    %c0_1 = arith.constant 0 : index
    %c0_2 = arith.constant 0 : index
    %1 = vector.load %arg3[%c0_1, %c0_2] : memref<16x64xf32, #tpu.memory_space<vmem>>, vector<16x64xf32>
    %cst = arith.constant dense<0.000000e+00> : vector<8x64xf32>
    %2 = tpu.matmul %0, %1, %cst {dimension_numbers = #tpu.dot_dimension_numbers<[1], [0], [0], [1], [0, 0, 1, 1], [], []>} : vector<8x16xf32>, vector<16x64xf32>, vector<8x64xf32> -> vector<8x64xf32>
    %c0_3 = arith.constant 0 : index
    %c0_4 = arith.constant 0 : index
    %3 = vector.load %arg4[%c0_3, %c0_4] : memref<1x64xf32, #tpu.memory_space<vmem>>, vector<1x64xf32>
    %4 = vector.broadcast %3 : vector<1x64xf32> to vector<8x64xf32>
    %5 = arith.addf %2, %4 : vector<8x64xf32>
    %cst_5 = arith.constant 0.000000e+00 : f32
    %6 = vector.broadcast %cst_5 : f32 to vector<8x64xf32>
    %7 = arith.maximumf %5, %6 : vector<8x64xf32>
    %c0_6 = arith.constant 0 : index
    %c0_7 = arith.constant 0 : index
    %8 = vector.load %arg5[%c0_6, %c0_7] : memref<64x128xf32, #tpu.memory_space<vmem>>, vector<64x128xf32>
    %cst_8 = arith.constant dense<0.000000e+00> : vector<8x128xf32>
    %9 = tpu.matmul %7, %8, %cst_8 {dimension_numbers = #tpu.dot_dimension_numbers<[1], [0], [0], [1], [0, 0, 1, 1], [], []>} : vector<8x64xf32>, vector<64x128xf32>, vector<8x128xf32> -> vector<8x128xf32>
    %c0_9 = arith.constant 0 : index
    %c0_10 = arith.constant 0 : index
    %10 = vector.load %arg2[%c0_9, %c0_10] : memref<8x4xf32, #tpu.memory_space<vmem>>, vector<8x4xf32>
    %c0_11 = arith.constant 0 : index
    %c0_12 = arith.constant 0 : index
    %11 = vector.load %arg6[%c0_11, %c0_12] : memref<4x128xf32, #tpu.memory_space<vmem>>, vector<4x128xf32>
    %cst_13 = arith.constant dense<0.000000e+00> : vector<8x128xf32>
    %12 = tpu.matmul %10, %11, %cst_13 {dimension_numbers = #tpu.dot_dimension_numbers<[1], [0], [0], [1], [0, 0, 1, 1], [], []>} : vector<8x4xf32>, vector<4x128xf32>, vector<8x128xf32> -> vector<8x128xf32>
    %13 = arith.addf %9, %12 : vector<8x128xf32>
    %c0_14 = arith.constant 0 : index
    %c0_15 = arith.constant 0 : index
    %14 = vector.load %arg7[%c0_14, %c0_15] : memref<1x128xf32, #tpu.memory_space<vmem>>, vector<1x128xf32>
    %15 = vector.broadcast %14 : vector<1x128xf32> to vector<8x128xf32>
    %16 = arith.addf %13, %15 : vector<8x128xf32>
    %cst_16 = arith.constant 0.000000e+00 : f32
    %17 = vector.broadcast %cst_16 : f32 to vector<8x128xf32>
    %18 = arith.maximumf %16, %17 : vector<8x128xf32>
    %c0_17 = arith.constant 0 : index
    %c0_18 = arith.constant 0 : index
    %19 = vector.load %arg8[%c0_17, %c0_18] : memref<128x1xf32, #tpu.memory_space<vmem>>, vector<128x1xf32>
    %cst_19 = arith.constant dense<0.000000e+00> : vector<8x1xf32>
    %20 = tpu.matmul %18, %19, %cst_19 {dimension_numbers = #tpu.dot_dimension_numbers<[1], [0], [0], [1], [0, 0, 1, 1], [], []>} : vector<8x128xf32>, vector<128x1xf32>, vector<8x1xf32> -> vector<8x1xf32>
    %21 = vector.shape_cast %20 : vector<8x1xf32> to vector<8xf32>
    %22 = vector.shape_cast %21 : vector<8xf32> to vector<1x8xf32>
    %c0_20 = arith.constant 0 : index
    %c0_21 = arith.constant 0 : index
    %23 = vector.load %arg9[%c0_20, %c0_21] : memref<1x1xf32, #tpu.memory_space<vmem>>, vector<1x1xf32>
    %24 = vector.broadcast %23 : vector<1x1xf32> to vector<1x8xf32>
    %25 = arith.addf %22, %24 : vector<1x8xf32>
    %c0_22 = arith.constant 0 : index
    %c0_23 = arith.constant 0 : index
    %26 = vector.load %arg10[%c0_22, %c0_23] : memref<1x8xf32, #tpu.memory_space<vmem>>, vector<1x8xf32>
    tpu.vector_store %arg10[%c0_22, %c0_23], %25 {strides = array<i32>} : memref<1x8xf32, #tpu.memory_space<vmem>>, vector<1x8xf32>,
    return
  }
  func.func @transform_0(%arg0: i32) -> (i32, i32) {
    %c0_i32 = arith.constant 0 : i32
    %c0_i32_0 = arith.constant 0 : i32
    return %arg0, %c0_i32 : i32, i32
  }
  func.func @transform_1(%arg0: i32) -> (i32, i32) {
    %c0_i32 = arith.constant 0 : i32
    %c0_i32_0 = arith.constant 0 : i32
    return %arg0, %c0_i32 : i32, i32
  }
  func.func @transform_2(%arg0: i32) -> (i32, i32) {
    %c0_i32 = arith.constant 0 : i32
    %c0_i32_0 = arith.constant 0 : i32
    %c0_i32_1 = arith.constant 0 : i32
    return %c0_i32, %c0_i32_0 : i32, i32
  }
  func.func @transform_3(%arg0: i32) -> (i32, i32) {
    %c0_i32 = arith.constant 0 : i32
    %c0_i32_0 = arith.constant 0 : i32
    %c0_i32_1 = arith.constant 0 : i32
    return %c0_i32, %c0_i32_0 : i32, i32
  }
  func.func @transform_4(%arg0: i32) -> (i32, i32) {
    %c0_i32 = arith.constant 0 : i32
    %c0_i32_0 = arith.constant 0 : i32
    %c0_i32_1 = arith.constant 0 : i32
    return %c0_i32, %c0_i32_0 : i32, i32
  }
  func.func @transform_5(%arg0: i32) -> (i32, i32) {
    %c0_i32 = arith.constant 0 : i32
    %c0_i32_0 = arith.constant 0 : i32
    %c0_i32_1 = arith.constant 0 : i32
    return %c0_i32, %c0_i32_0 : i32, i32
  }
  func.func @transform_6(%arg0: i32) -> (i32, i32) {
    %c0_i32 = arith.constant 0 : i32
    %c0_i32_0 = arith.constant 0 : i32
    %c0_i32_1 = arith.constant 0 : i32
    return %c0_i32, %c0_i32_0 : i32, i32
  }
  func.func @transform_7(%arg0: i32) -> (i32, i32) {
    %c0_i32 = arith.constant 0 : i32
    %c0_i32_0 = arith.constant 0 : i32
    %c0_i32_1 = arith.constant 0 : i32
    return %c0_i32, %c0_i32_0 : i32, i32
  }
  func.func @transform_8(%arg0: i32) -> (i32, i32) {
    %c0_i32 = arith.constant 0 : i32
    %c0_i32_0 = arith.constant 0 : i32
    %c0_i32_1 = arith.constant 0 : i32
    return %c0_i32, %c0_i32_0 : i32, i32
  }
  func.func @transform_9(%arg0: i32) -> (i32, i32) {
    %c0_i32 = arith.constant 0 : i32
    %c0_i32_0 = arith.constant 0 : i32
    return %arg0, %c0_i32 : i32, i32
  }
}

</mosaic_0001>

<bundles_post_ra>
// kernel: tpu_custom_call.1
= control target key start
LH: loop header
LB: loop body
LE: loop exit
PB: predicated region body
PF: predicated region fallthrough
CT: control target
= control target key end

     0   :  { %s767_s0 = inlined_call_operand.vmem [shape: f32[8,16], index: 0, kind: input, shape index: {}]   ;;  %s768_s1 = inlined_call_operand.vmem [shape: f32[8,4], index: 1, kind: input, shape index: {}]   ;;  %s769_s2 = inlined_call_operand.vmem [shape: f32[16,64], index: 2, kind: input, shape index: {}]   ;;  %s770_s3 = inlined_call_operand.vmem [shape: f32[1,64], index: 3, kind: input, shape index: {}]   ;;  %s771_s4 = inlined_call_operand.vmem [shape: f32[64,128], index: 4, kind: input, shape index: {}]   ;;  %s772_s5 = inlined_call_operand.vmem [shape: f32[4,128], index: 5, kind: input, shape index: {}]   ;;  %s773_s6 = inlined_call_operand.vmem [shape: f32[1,128], index: 6, kind: input, shape index: {}]   ;;  %s774_s7 = inlined_call_operand.vmem [shape: f32[128,1], index: 7, kind: input, shape index: {}]   ;;  %s775_s8 = inlined_call_operand.<no memory space> [shape: f32[1,1], index: 8, kind: input, shape index: {}]   ;;  %s776_s9 = inlined_call_operand.hbm [shape: f32[1,8], index: 9, kind: output, shape index: {}]  }
   0x1   :  { %v14_v0 = vstv %s775_s8 }
   0x2   :  { %15 = vst [vmem:[#allocation2] sm:$0x1] %v14_v0 }
   0x3   :  { %v36_v1 = vld [vmem:[%s769_s2] sm:$0xff]  ;;  %v37_v2 = vld [vmem:[%s769_s2 + $0x8] sm:$0xff]  ;;  %v587_v3 = vmov 0.0|0.0   ;;  %vm588_vm0 = vmmov 0   ;;  %v589_v5 = vmov 0.0   ;;  %vm45_vm1 = vcmask 130048  }
   0x4   :  { %518 = vmatprep.subr.bf16.mxu1 %v587_v3  ;;  %v519_v4 = vpack.c.bf16 %v37_v2, %v36_v1  ;;  %456 = vmatprep.mubr.msk.f32.mxu1 %vm588_vm0, %v589_v5  ;;  %v35_v6 = vld [vmem:[%s767_s0] sm:$0xff]  ;;  %vm134_vm2 = vcmask 1043456   ;;  %v121_v9 = vld [vmem:[%s771_s4 + $0x8] sm:$0xff] }
   0x5   :  { %533 = vmatprep.subr.bf16.mxu0 %v587_v3  ;;  %515 = vmatprep.mubr.msk.f32.mxu0 %vm588_vm0, %v589_v5  ;;  %v129_v7 = vld [vmem:[%s772_s5] sm:$0xf] }
   0x6   :  { %520 = vmatpush3.bf16.msra.mxu1 %v519_v4  ;;  %v120_v8 = vld [vmem:[%s771_s4] sm:$0xff] }
   0x7   :  { %459 = vmatprep.subr.mxu1 %v589_v5 }
   0x8   :  { %16 = vsyncpa [#allocation4], 0  ;;  %v128_v10 = vld [vmem:[%s768_s1] sm:$0xff]  ;;  %vm130_vm3 = vcmask 31744   ;;  %v522_v11 = vpack.c.bf16 %v121_v9, %v120_v8  ;;  %v122_v12 = vld [vmem:[%s771_s4 + $0x10] sm:$0xff]  ;;  %vm208_vm4 = vcmask 523264   ;;  %v383_v60 = vlaneseq }
   0x9   :  { %457 = vmatmul.mubr.msk.f32.vlgmr.msra.gmra.mrb[0].mxu1 %vm45_vm1, %v35_v6  ;;  %v123_v13 = vld [vmem:[%s771_s4 + $0x18] sm:$0xff]  ;;  %v124_v15 = vld [vmem:[%s771_s4 + $0x20] sm:$0xff]  ;;  %v125_v16 = vld [vmem:[%s771_s4 + $0x28] sm:$0xff]  ;;  %v590_v53 = vmov 0   ;;  %vm399_vm5 = vcmask 57344  }
   0xa   :  { %460 = vmatpush3.msk.msra.mxu1 %vm134_vm2, %v129_v7  ;;  %461 = vmatprep.mubr.msk.f32.mxu1 %vm588_vm0, %v589_v5  ;;  %v525_v14 = vpack.c.bf16 %v123_v13, %v122_v12  ;;  %v528_v17 = vpack.c.bf16 %v125_v16, %v124_v15  ;;  %v126_v18 = vld [vmem:[%s771_s4 + $0x30] sm:$0xff]  ;;  %v127_v19 = vld [vmem:[%s771_s4 + $0x38] sm:$0xff]  ;;  %v291_v21 = vld [vmem:[%s774_s7] sm:$0xff]  ;;  %v384_v61 = vshrl.u32 %v383_v60, 7  ;;  %v393_v4 = vand.u32 127, %v383_v60 }
   0xb   :  { %521 = vmatprep.subr.bf16.mxu1 %v587_v3  ;;  %v531_v20 = vpack.c.bf16 %v127_v19, %v126_v18  ;;  %v292_v22 = vld [vmem:[%s774_s7 + $0x8] sm:$0xff]  ;;  %v293_v23 = vld [vmem:[%s774_s7 + $0x10] sm:$0xff]  ;;  %v294_v25 = vld [vmem:[%s774_s7 + $0x18] sm:$0xff]  ;;  %562 = vset.pattern.permute.xlu0 %v590_v53 }
   0xc   :  { %v534_v24 = vpack.c.bf16 %v292_v22, %v291_v21  ;;  %v537_v26 = vpack.c.bf16 %v294_v25, %v293_v23  ;;  %v295_v27 = vld [vmem:[%s774_s7 + $0x20] sm:$0xff]  ;;  %v296_v28 = vld [vmem:[%s774_s7 + $0x28] sm:$0xff]  ;;  %v297_v30 = vld [vmem:[%s774_s7 + $0x30] sm:$0xff]  ;;  %v385_v62 = vsub.s32 0, %v384_v61 }
   0xd   :  { %462 = vmatmul.mubr.msk.f32.vlgmr.msra.gmra.mrb[2].mxu1 %vm130_vm3, %v128_v10  ;;  %v540_v29 = vpack.c.bf16 %v296_v28, %v295_v27  ;;  %v298_v31 = vld [vmem:[%s774_s7 + $0x38] sm:$0xff]  ;;  %v299_v33 = vld [vmem:[%s774_s7 + $0x40] sm:$0xff]  ;;  %v300_v34 = vld [vmem:[%s774_s7 + $0x48] sm:$0xff] }
   0xe   :  { %523 = vmatpush3.bf16.msra.mxu1 %v522_v11  ;;  %480 = vmatprep.mubr.msk.f32.mxu1 %vm588_vm0, %v589_v5  ;;  %v543_v32 = vpack.c.bf16 %v298_v31, %v297_v30  ;;  %v546_v35 = vpack.c.bf16 %v300_v34, %v299_v33  ;;  %v301_v36 = vld [vmem:[%s774_s7 + $0x50] sm:$0xff]  ;;  %v302_v37 = vld [vmem:[%s774_s7 + $0x58] sm:$0xff]  ;;  %v415_v39 = vld [vmem:[%s770_s3] ss:$0 sm:$0xff]  ;;  %v396_v5 = vsub.s32 %v393_v4, %v384_v61 }
   0xf   :  { %524 = vmatprep.subr.bf16.mxu1 %v587_v3  ;;  %535 = vmatpush3.bf16.msra.mxu0 %v534_v24  ;;  %v549_v38 = vpack.c.bf16 %v302_v37, %v301_v36  ;;  %v303_v46 = vld [vmem:[%s774_s7 + $0x60] sm:$0xff]  ;;  %v304_v47 = vld [vmem:[%s774_s7 + $0x68] sm:$0xff]  ;;  %v305_v49 = vld [vmem:[%s774_s7 + $0x70] sm:$0xff] }
  0x10   :  { %536 = vmatprep.subr.bf16.mxu0 %v587_v3  ;;  %v552_v48 = vpack.c.bf16 %v304_v47, %v303_v46  ;;  %v306_v50 = vld [vmem:[%s774_s7 + $0x78] sm:$0xff]  ;;  %v377_v52 = vld [vmem:[#allocation2] sm:$0x1]  ;;  %s591_s7 = smov [#allocation3]  }
  0x11   :  { %v555_v51 = vpack.c.bf16 %v306_v50, %v305_v49  ;;  %380 = vperm.xlu0 %562, %v377_v52   ;;  %v420_v55 = vld [vmem:[%s773_s6] ss:$0 sm:$0xff]  ;;  %s407_s4 = sshll.u32 %s591_s7, 4  ;;  %s408_s4 = int_to_ptr.vmem [resolvable:$true] %s407_s4 }
  0x12   :  { %526 = vmatpush3.bf16.msra.mxu1 %v525_v14  ;;  %s563_s6 = scalar_lea.vmem %s408_s4, 16  ;;  %s567_s17 = scalar_lea.vmem %s408_s4, 32 }
  0x13   :  { %527 = vmatprep.subr.bf16.mxu1 %v587_v3  ;;  %538 = vmatpush3.bf16.msra.mxu0 %v537_v26  ;;  %p564_p0 = scmp.ne.s32.totalorder %s408_s4, %s563_s6  ;;  %p568_p1 = scmp.lt.s32.totalorder %s408_s4, %s408_s4 }
  0x14   :  { %539 = vmatprep.subr.bf16.mxu0 %v587_v3  ;;  %p569_p2 = scmp.lt.s32.totalorder %s567_s17, %s563_s6 }
  0x16   :  { %529 = vmatpush3.bf16.msra.mxu1 %v528_v17  ;;  %p570_p3 = por %p569_p2, %p568_p1 }
  0x17   :  { %530 = vmatprep.subr.bf16.mxu1 %v587_v3  ;;  %541 = vmatpush3.bf16.msra.mxu0 %v540_v29 }
  0x18   :  { %542 = vmatprep.subr.bf16.mxu0 %v587_v3  ;;  %p571_p4 = pnand %p570_p3, %p564_p0 }
  0x1a   :  { %532 = vmatpush3.bf16.msra.mxu1 %v531_v20 }
  0x1b   :  { %544 = vmatpush3.bf16.msra.mxu0 %v543_v32 }
  0x1c   :  { %545 = vmatprep.subr.bf16.mxu0 %v587_v3 }
  0x1f   :  { %547 = vmatpush3.bf16.msra.mxu0 %v546_v35 }
  0x20   :  { %548 = vmatprep.subr.bf16.mxu0 %v587_v3 }
  0x23   :  { %550 = vmatpush3.bf16.msra.mxu0 %v549_v38 }
  0x24   :  { %551 = vmatprep.subr.bf16.mxu0 %v587_v3 }
  0x27   :  { %553 = vmatpush3.bf16.msra.mxu0 %v552_v48 }
  0x28   :  { %554 = vmatprep.subr.bf16.mxu0 %v587_v3 }
  0x2b   :  { %556 = vmatpush3.bf16.msra.mxu0 %v555_v51 }
  0x90   :  { %v381_v63 = vpop.permute.xlu0 %380 }
  0x91   :  { %v386_v0 = vrot.slane %v381_v63, %v385_v62 }
  0xdc   :  { %v115_v40 = vpop.f32.mrb[0].mxu1 }
  0xdd   :  { %v116_v41 = vadd.f32 %v415_v39, %v115_v40  ;;  %v458_v42 = vpop.f32.mrb[1].mxu1 }
  0xdf   :  { %v119_v43 = vmax.f32 %v116_v41, 0.0 }
  0xe0   :  { %v204_v44 = vpop.f32.mrb[2].mxu1 }
  0xe1   :  { %481 = vmatmul.mubr.msk.f32.vlgmr.msra.gmra.mrb[4].mxu1 %vm208_vm4, %v119_v43  ;;  %v463_v45 = vpop.f32.mrb[3].mxu1 }
 0x1b4   :  { %v278_v54 = vpop.f32.mrb[4].mxu1 }
 0x1b5   :  { %v279_v56 = vadd.f32 %v278_v54, %v204_v44  ;;  %v482_v57 = vpop.f32.mrb[5].mxu1 }
 0x1b7   :  { %v289_v58 = vadd.f32 %v420_v55, %v279_v56 }
 0x1b9   :  { %v290_v59 = vmax.f32 %v289_v58, 0.0 }
 0x1bb   :  { %516 = vmatmul.mubr.f32.vlgmr.msra.gmra.mrb[0].mxu0 %v290_v59 }
 0x28e   :  { %v373_v1 = vpop.f32.mrb[0].mxu0 }
 0x28f   :  { %v387_v2 = vadd.f32 %v386_v0, %v373_v1  ;;  %v517_v3 = vpop.f32.mrb[1].mxu0 }
 0x291   :  { %390 = vperm.xlu0 %562, %v387_v2  }
 0x310   :  { %v391_v6 = vpop.permute.xlu0 %390 }
 0x311   :  { %v397_v7 = vrot.slane %v391_v6, %v396_v5 }
 0x313   :  { %400 = vst.msk [vmem:[#allocation3] sm:$0x1] %vm399_vm5, %v397_v7 }
 0x314   :  { %574 = shalt.err (!%p571_p4)
}
 0x315   :  { %s575_s20 = scalar_lea.hbm %s776_s9, 16 }
 0x316   :  { %p576_p5 = scmp.ne.s32.totalorder %s776_s9, %s575_s20  ;;  %p579_p6 = scmp.lt.u32.totalorder %s575_s20, %s776_s9 }
 0x318   :  { %p581_p7 = pnand %p579_p6, %p576_p5 }
 0x31a   :  { %584 = shalt.err (!%p581_p7)
}
 0x31b   :  { %410 = dma.vmem_to_hbm [thread:$0]  %s408_s4, 16, %s776_s9, [#allocation4]  }
 0x31c   :  { %585 = dma.done.wait [#allocation4], 16  }
 0x31d   :  { %586 = vsyncadd [#allocation4], 4294967280 }
 0x31e   :  { %414 = vsyncpa [#allocation4], 1 }

</bundles_post_ra>
